<compile_context>
chip_gen: v6e
topology: v6e:2x2x1
jax: 0.10.0
libtpu: 0.0.40
codegen_flags: <defaults>
</compile_context>

<pallas_src>
import functools

import jax
import jax.numpy as jnp
from jax.experimental import pallas as pl
from jax.experimental.pallas import tpu as pltpu


def linear_kernel(x_ref, w_ref, b_ref, o_ref):
    # x_ref: (IN=2, TB) VMEM | w_ref: (2,) SMEM | b_ref: (1,) SMEM | o_ref: (1, TB) VMEM
    w0 = w_ref[0]
    w1 = w_ref[1]
    bias = b_ref[0]
    x = x_ref[...]                                   # (2, TB)
    # Pure VPU: two scalar*vector mults + two adds, one full-lane (unmasked) store.
    o_ref[...] = x[0:1, :] * w0 + x[1:2, :] * w1 + bias


def linear_forward(x, w, b, *, max_tb=65536):
    """y = x @ W.T + b  (torch.nn.Linear(2, 1) semantics).

    x: (B, 2) f32, w: (2,) f32 (flattened Linear weight), b: (1,) f32.
    Returns (B, 1) f32.
    """
    B, IN = x.shape
    assert IN == 2, "LinearRegressionModel expects in_features=2"

    # Lane-dense batch tile: power-of-two, >=128 (full lane width), capped so the
    # per-tile VMEM footprint stays small even for very large batches.
    tb = max(128, min(pl.next_power_of_2(B), max_tb))
    n_tiles = pl.cdiv(B, tb)
    b_pad = n_tiles * tb

    # Present the batch on the lane axis: x_t is (IN, B_pad); zero-pad the tail.
    x_t = jnp.pad(x.T, ((0, 0), (0, b_pad - B)))

    flops = 4 * B * IN                       # 2 mul + 2 add per output element
    bytes_accessed = (B * IN + B + IN + 1) * 4

    y_pad = pl.pallas_call(
        linear_kernel,
        out_shape=jax.ShapeDtypeStruct((1, b_pad), jnp.float32),
        grid_spec=pltpu.PrefetchScalarGridSpec(
            num_scalar_prefetch=0,
            grid=(n_tiles,),
            in_specs=[
                # x tile: (IN, TB), batch tiled along the 128-wide lane axis.
                pl.BlockSpec((IN, tb), lambda i: (0, i)),
                # weight + bias: tiny whole arrays in SMEM, read as scalars.
                pl.BlockSpec(memory_space=pltpu.MemorySpace.SMEM),
                pl.BlockSpec(memory_space=pltpu.MemorySpace.SMEM),
            ],
            out_specs=pl.BlockSpec((1, tb), lambda i: (0, i)),
        ),
        compiler_params=pltpu.CompilerParams(
            dimension_semantics=("parallel",),   # batch tiles are independent
            vmem_limit_bytes=32 * 1024 * 1024,   # safe on v5e/v6e/v7x; tiles are tiny
        ),
        cost_estimate=pl.CostEstimate(
            flops=flops, transcendentals=0, bytes_accessed=bytes_accessed
        ),
    )(x_t, w, b)

    # Back to PyTorch's (B, out_features=1) layout.
    return y_pad[:, :B].T


_linear_forward_jit = jax.jit(functools.partial(linear_forward))


class LinearRegressionModel:
    """JAX/Pallas port of the PyTorch LinearRegressionModel (Linear(2, 1, bias=True))."""

    def __init__(self, key):
        k_w, k_b = jax.random.split(key)
        # torch.nn.Linear(2, 1): weight (1, 2), bias (1,), U(-1/sqrt(2), 1/sqrt(2)).
        bound = 1.0 / jnp.sqrt(2.0)
        self.weight = jax.random.uniform(k_w, (1, 2), jnp.float32, -bound, bound)
        self.bias = jax.random.uniform(k_b, (1,), jnp.float32, -bound, bound)
        # Kernel-side parameter layout: flat (2,) weight and (1,) bias for SMEM.
        self.w_flat = self.weight.reshape(-1)    # (2,)
        self.b_flat = self.bias.reshape(-1)      # (1,)

    def __call__(self, x):
        return _linear_forward_jit(x, self.w_flat, self.b_flat)


if __name__ == "__main__":
    key = jax.random.PRNGKey(0)
    k_model, k_x = jax.random.split(key)

    model = LinearRegressionModel(k_model)

    # Small deterministic input: batch=8, in_features=2 (matches Linear(2, 1)).
    x = jax.random.normal(k_x, (8, 2), dtype=jnp.float32)

    y = model(x)
    jax.block_until_ready(y)

    # Reference check against plain JAX (same semantics as torch Linear).
    y_ref = x @ model.weight.T + model.bias
    assert y.shape == (8, 1)
    assert jnp.allclose(y, y_ref, atol=1e-5, rtol=1e-5)

    print("KERNEL_OK")
</pallas_src>

<mosaic_0001>
module attributes {stable_mosaic.version = 11 : i64} {
  func.func @linear_kernel(%arg0: i32, %arg1: memref<2x128xf32, #tpu.memory_space<vmem>>, %arg2: memref<2xf32, #tpu.memory_space<smem>>, %arg3: memref<1xf32, #tpu.memory_space<smem>>, %arg4: memref<1x128xf32, #tpu.memory_space<vmem>>) attributes {dimension_semantics = [#tpu.dimension_semantics<parallel>], iteration_bounds = array<i64: 1>, scalar_prefetch = 0 : i64, scratch_operands = 0 : i64, tpu.core_type = #tpu.core_type<tc>, window_params = [{transform_indices = @transform_0, window_bounds = array<i64: 2, 128>}, {transform_indices = @transform_1, window_bounds = array<i64: 2>}, {transform_indices = @transform_2, window_bounds = array<i64: 1>}, {transform_indices = @transform_3, window_bounds = array<i64: 1, 128>}]} {
    %c0 = arith.constant 0 : index
    %0 = memref.load %arg2[%c0] : memref<2xf32, #tpu.memory_space<smem>>
    %c1 = arith.constant 1 : index
    %1 = memref.load %arg2[%c1] : memref<2xf32, #tpu.memory_space<smem>>
    %c0_0 = arith.constant 0 : index
    %2 = memref.load %arg3[%c0_0] : memref<1xf32, #tpu.memory_space<smem>>
    %c0_1 = arith.constant 0 : index
    %c0_2 = arith.constant 0 : index
    %3 = vector.load %arg1[%c0_1, %c0_2] : memref<2x128xf32, #tpu.memory_space<vmem>>, vector<2x128xf32>
    %4 = vector.extract_strided_slice %3 {offsets = [0, 0], sizes = [1, 128], strides = [1, 1]} : vector<2x128xf32> to vector<1x128xf32>
    %5 = vector.broadcast %0 : f32 to vector<1x128xf32>
    %6 = arith.mulf %4, %5 : vector<1x128xf32>
    %7 = vector.extract_strided_slice %3 {offsets = [1, 0], sizes = [1, 128], strides = [1, 1]} : vector<2x128xf32> to vector<1x128xf32>
    %8 = vector.broadcast %1 : f32 to vector<1x128xf32>
    %9 = arith.mulf %7, %8 : vector<1x128xf32>
    %10 = arith.addf %6, %9 : vector<1x128xf32>
    %11 = vector.broadcast %2 : f32 to vector<1x128xf32>
    %12 = arith.addf %10, %11 : vector<1x128xf32>
    %c0_3 = arith.constant 0 : index
    %c0_4 = arith.constant 0 : index
    %13 = vector.load %arg4[%c0_3, %c0_4] : memref<1x128xf32, #tpu.memory_space<vmem>>, vector<1x128xf32>
    tpu.vector_store %arg4[%c0_3, %c0_4], %12 {strides = array<i32>} : memref<1x128xf32, #tpu.memory_space<vmem>>, vector<1x128xf32>,
    return
  }
  func.func @transform_0(%arg0: i32) -> (i32, i32) {
    %c0_i32 = arith.constant 0 : i32
    %c0_i32_0 = arith.constant 0 : i32
    return %c0_i32, %arg0 : i32, i32
  }
  func.func @transform_1(%arg0: i32) -> i32 {
    %c0_i32 = arith.constant 0 : i32
    %c0_i32_0 = arith.constant 0 : i32
    return %c0_i32 : i32
  }
  func.func @transform_2(%arg0: i32) -> i32 {
    %c0_i32 = arith.constant 0 : i32
    %c0_i32_0 = arith.constant 0 : i32
    return %c0_i32 : i32
  }
  func.func @transform_3(%arg0: i32) -> (i32, i32) {
    %c0_i32 = arith.constant 0 : i32
    %c0_i32_0 = arith.constant 0 : i32
    return %c0_i32, %arg0 : i32, i32
  }
}

</mosaic_0001>

<bundles_post_ra>
// kernel: linear_forward.1
= control target key start
LH: loop header
LB: loop body
LE: loop exit
PB: predicated region body
PF: predicated region fallthrough
CT: control target
= control target key end

     0   :  { %9 = vsyncpa [#allocation4], 0  ;;  %s97_s0 = inlined_call_operand.vmem [shape: f32[2,128], index: 0, kind: input, shape index: {}]   ;;  %s98_s1 = inlined_call_operand.vmem [shape: f32[2], index: 1, kind: input, shape index: {}]   ;;  %s99_s2 = inlined_call_operand.<no memory space> [shape: f32[1], index: 2, kind: input, shape index: {}]   ;;  %s100_s3 = inlined_call_operand.vmem [shape: f32[1,128], index: 3, kind: output, shape index: {}]  }
   0x1   :  { %s18_s14 = sshll.u32 %s98_s1, 4  ;;  %s19_s14 = int_to_ptr.vmem [resolvable:$true] %s18_s14 }
   0x2   :  { %s50_s15 = scalar_lea.vmem %s19_s14, 16  ;;  %p55_p1 = scmp.lt.s32.totalorder %s19_s14, %s19_s14 }
   0x3   :  { %p51_p0 = scmp.ne.s32.totalorder %s19_s14, %s50_s15  ;;  %p56_p2 = scmp.lt.s32.totalorder %s50_s15, %s50_s15 }
   0x5   :  { %p57_p3 = por %p56_p2, %p55_p1 }
   0x7   :  { %p58_p4 = pnand %p57_p3, %p51_p0 }
   0x9   :  { %61 = shalt.err (!%p58_p4)
}
   0xa   :  { %s64_s16 = smov [#allocation3]  }
   0xb   :  { %21 = dma.vmem_to_smem %s19_s14, 16, %s64_s16, [#allocation4]  }
   0xc   :  { %62 = dma.done.wait [#allocation4], 16  }
   0xd   :  { %63 = vsyncadd [#allocation4], 4294967280 }
   0xe   :  { %27 = sfence }
   0xf   :  { %s28_s17 = sld [smem:[#allocation3]]  ;;  %v31_v0 = vld [vmem:[%s97_s0] sm:$0x3]  ;;  %v40_v6 = vstv %s99_s2 }
  0x10   :  { %s48_s18 = sld [smem:[#allocation3 + $0x1]] }
  0x15   :  { %v32_v1 = vstv %s28_s17 }
  0x16   :  { %v34_v2 = vstv %s48_s18  ;;  %v33_v3 = vmul.f32 %v32_v1, %v31_v0 }
  0x17   :  { %v35_v4 = vmul.f32 %v34_v2, %v31_v0 }
  0x19   :  { %v37_v5 = vrot.slane %v35_v4, 1 }
  0x1b   :  { %v39_v7 = vadd.f32 %v37_v5, %v33_v3 }
  0x1d   :  { %v41_v8 = vadd.f32 %v40_v6, %v39_v7 }
  0x1f   :  { %42 = vst [vmem:[%s100_s3] sm:$0x1] %v41_v8 }
  0x20   :  { %47 = vsyncpa [#allocation4], 1 }

</bundles_post_ra>
